<compile_context>
chip_gen: v5e
topology: v5e:2x2
jax: 0.10.0
libtpu: 0.0.40
codegen_flags: <defaults>
</compile_context>

<pallas_src>
from functools import lru_cache

import numpy as np
import jax
import jax.numpy as jnp
from jax.experimental import pallas as pl
from jax.experimental.pallas import tpu as pltpu

# ----------------------------------------------------------------------------
# PU21 banding-glare parameters (Mantiuk et al., 2021)
# ----------------------------------------------------------------------------
_PU21_BANDING_GLARE = (
    0.353487901, 0.3734658629, 8.277049286e-05,
    0.9062562627, 0.09150303166, 0.9099130235, 596.3148142,
)
_PU21_Y_MIN = 0.005
_PU21_Y_MAX = 10000.0
_DISPLAY_GAMMA = 2.2

# Lane-dense slab tiling: lane width (multiple of 128) and max row block (multiple of 8/16).
_LANE = 1024
_MAX_BLOCK_ROWS = 1024        # 1024x1024 f32 = 4 MiB/buffer; in+out double-buffered ~16 MiB
_POLY_TOL = 2.5e-4            # max abs error of the fitted polynomial (output span ~3)
_POLY_MAX_DEG = 20


def _pu21_encode_np(Y):
    """Reference PU21 encode on numpy scalars/arrays (float64)."""
    p1, p2, p3, p4, p5, p6, p7 = _PU21_BANDING_GLARE
    Y = np.clip(Y, _PU21_Y_MIN, _PU21_Y_MAX)
    Yp = Y ** p4
    return p7 * (((p1 + p2 * Yp) / (1.0 + p3 * Yp)) ** p5 - p6)


def _fold_constants(L_max, L_min, L_cr, reflectivity, E_amb, norm_mean, norm_std):
    """Fold every module scalar into (dm_gain, dm_offset, scale_A, bias_B)."""
    p1, p2, p3, p4, p5, p6, p7 = _PU21_BANDING_GLARE
    # DisplayModel (DM_TYPE_SRGB_SIMPLE) constants.
    # TODO(synk): black level modeled as L_blk = L_min / L_cr; verify against the exact
    # formula of the original DisplayModel before trusting absolute accuracy.
    L_blk = float(L_min) / float(L_cr)
    L_refl = 0.0 if E_amb is None else float(reflectivity) / np.pi * float(E_amb)
    dm_gain = float(L_max) - L_blk
    dm_offset = L_blk + L_refl

    # normalize_pu + normalize_pu_range_srgb: divide by PU21(100 cd/m^2)
    inv_P_srgb = float(1.0 / _pu21_encode_np(100.0))

    # Fold PU scale, -p6, sRGB normalization and mean/std into one scale/bias:
    #   out = Q**p5 * scale_A + bias_B,   Q = (p1 + p2*Yp) / (1 + p3*Yp)
    mean = float(norm_mean[0])
    inv_std = float(1.0 / norm_std[0])
    scale_A = float(p7 * inv_P_srgb * inv_std)
    bias_B = float(-(p7 * p6 * inv_P_srgb + mean) * inv_std)
    return dm_gain, dm_offset, scale_A, bias_B


@lru_cache(maxsize=None)
def _fit_sqrt_poly(dm_gain, dm_offset, scale_A, bias_B):
    """Fit out(V) as a polynomial in s = 2*sqrt(V) - 1 over V in [0, 1].

    sqrt(V) removes the V^2.2 endpoint singularity (becomes t^4.4, i.e. C^4 smooth) so a
    low-degree Chebyshev fit converges fast.  The monomial coefficients are verified with
    a float32 Horner emulation against the exact float64 map; returns None if the target
    tolerance is not reached (caller falls back to the exact EUP path).
    """
    p1, p2, p3, p4, p5, _p6, _p7 = _PU21_BANDING_GLARE
    t = np.linspace(0.0, 1.0, 8193, dtype=np.float64)
    V = t * t
    L = dm_gain * (V ** _DISPLAY_GAMMA) + dm_offset
    Y = np.clip(L, _PU21_Y_MIN, _PU21_Y_MAX)
    Yp = Y ** p4
    Q = (p1 + p2 * Yp) / (1.0 + p3 * Yp)
    y = (Q ** p5) * scale_A + bias_B

    s64 = 2.0 * t - 1.0
    s32 = s64.astype(np.float32)
    for deg in range(6, _POLY_MAX_DEG + 1):
        cheb = np.polynomial.chebyshev.chebfit(s64, y, deg)
        mono = np.polynomial.chebyshev.cheb2poly(cheb).astype(np.float32)
        # Emulate the in-kernel float32 Horner evaluation.
        acc = np.full_like(s32, mono[-1])
        for a in mono[-2::-1]:
            acc = (acc * s32 + np.float32(a)).astype(np.float32)
        err = float(np.max(np.abs(acc.astype(np.float64) - y)))
        if err <= _POLY_TOL:
            return tuple(float(v) for v in mono)
    return None


def _make_pu_display_kernel(dm_gain, dm_offset, scale_A, bias_B, poly):
    """Build the fused elementwise kernel with all module constants baked in."""
    p1, p2, p3, p4, p5, _p6, _p7 = (float(v) for v in _PU21_BANDING_GLARE)

    if poly is not None:
        coeffs = tuple(float(c) for c in poly)

        def kernel(x_ref, o_ref):
            x = x_ref[...].astype(jnp.float32)
            V = jnp.clip(x, 0.0, 1.0)
            s = 2.0 * jnp.sqrt(V) - 1.0            # single EUP op per element
            acc = coeffs[-1] * s + coeffs[-2]      # Horner: pure VPU FMAs
            for a in coeffs[-3::-1]:
                acc = acc * s + a
            o_ref[...] = acc.astype(o_ref.dtype)

        return kernel

    # Exact fallback path: 3 pows + exp/log restructuring (no approx reciprocal), and the
    # PU21 input clip is elided whenever the display-model output range already satisfies it.
    skip_clip = (dm_gain >= 0.0 and dm_offset >= _PU21_Y_MIN
                 and dm_gain + dm_offset <= _PU21_Y_MAX)

    def kernel(x_ref, o_ref):
        x = x_ref[...].astype(jnp.float32)
        V = jnp.clip(x, 0.0, 1.0)
        L = dm_gain * (V ** _DISPLAY_GAMMA) + dm_offset
        Y = L if skip_clip else jnp.clip(L, _PU21_Y_MIN, _PU21_Y_MAX)
        Yp = Y ** p4
        q = jnp.exp(p5 * (jnp.log(p1 + p2 * Yp) - jnp.log(1.0 + p3 * Yp)))
        o_ref[...] = (q * scale_A + bias_B).astype(o_ref.dtype)

    return kernel


def pu_display_forward(x, *, display_L_max=1000.0, display_L_min=1.0,
                       display_L_cr=1.0, display_reflectivity=0.01,
                       E_amb=None,
                       norm_mean=(0.5, 0.5, 0.5), norm_std=(0.5, 0.5, 0.5),
                       use_polynomial=True):
    """PuDisplayWrapper.dm_pu(x, E_amb) as a single fused Pallas kernel.

    x: [N, C, H, W] float array (NCHW, PyTorch layout), values expected in [0, 1].
    Returns an array of the same shape/dtype. bfloat16 input also works (compute is f32).
    """
    # The tensor is flattened channel-agnostically, so per-channel normalization must be
    # uniform across channels (true for the module defaults mean=std=(0.5,0.5,0.5)).
    assert all(float(m) == float(norm_mean[0]) for m in norm_mean), "non-uniform mean unsupported"
    assert all(float(s) == float(norm_std[0]) for s in norm_std), "non-uniform std unsupported"
    # TODO(synk): support non-uniform per-channel mean/std (e.g. ImageNet) by keeping the
    # channel axis addressable in the block layout.

    orig_shape = x.shape
    orig_dtype = x.dtype
    total = int(np.prod(orig_shape))

    # Sublane alignment for the packed dtype (f32: 8, bf16/f16: 16, int8/fp8: 32).
    itemsize = int(np.dtype(orig_dtype).itemsize)
    row_align = {4: 8, 2: 16, 1: 32}.get(itemsize, 8)

    # Flatten to a lane-dense 2D slab.  Pad only to a whole number of aligned rows
    # (row_align * _LANE elements) — NOT to a whole block — so typical image sizes need
    # no pad/slice copy at all; ragged last blocks are masked by Pallas.
    pad_unit = row_align * _LANE
    padded = int(pl.cdiv(total, pad_unit)) * pad_unit
    flat = x.reshape(total)
    if padded != total:
        flat = jnp.pad(flat, (0, padded - total))
    rows = padded // _LANE
    x2 = flat.reshape(rows, _LANE)

    # Block-row choice: as fat as VMEM allows, but keep >= 2 grid steps when the input
    # allows it (v7x megacore shards the parallel grid axis across its 2 TensorCores).
    if rows > _MAX_BLOCK_ROWS:
        block_rows = _MAX_BLOCK_ROWS
    else:
        half = int(pl.cdiv(rows, 2))
        block_rows = int(pl.cdiv(half, row_align)) * row_align
        block_rows = max(row_align, min(block_rows, rows))
    grid = (int(pl.cdiv(rows, block_rows)),)

    dm_gain, dm_offset, scale_A, bias_B = _fold_constants(
        display_L_max, display_L_min, display_L_cr, display_reflectivity,
        E_amb, norm_mean, norm_std)
    poly = _fit_sqrt_poly(dm_gain, dm_offset, scale_A, bias_B) if use_polynomial else None
    kernel = _make_pu_display_kernel(dm_gain, dm_offset, scale_A, bias_B, poly)

    out2 = pl.pallas_call(
        kernel,
        out_shape=jax.ShapeDtypeStruct((rows, _LANE), orig_dtype),
        grid=grid,
        in_specs=[pl.BlockSpec((block_rows, _LANE), lambda i: (i, 0))],
        out_specs=pl.BlockSpec((block_rows, _LANE), lambda i: (i, 0)),
        compiler_params=pltpu.CompilerParams(
            dimension_semantics=("parallel",),
            vmem_limit_bytes=32 << 20),
    )(x2)

    out_flat = out2.reshape(padded)
    if padded != total:
        out_flat = out_flat[:total]
    return out_flat.reshape(orig_shape)


def _reference_forward(x, **kw):
    """Pure-JAX reference (exact PU21 math) for correctness checking."""
    L_max = kw.get("display_L_max", 1000.0)
    L_min = kw.get("display_L_min", 1.0)
    L_cr = kw.get("display_L_cr", 1.0)
    refl = kw.get("display_reflectivity", 0.01)
    E_amb = kw.get("E_amb", None)
    p1, p2, p3, p4, p5, p6, p7 = _PU21_BANDING_GLARE
    L_blk = L_min / L_cr
    L_refl = 0.0 if E_amb is None else refl / np.pi * E_amb
    V = jnp.clip(x.astype(jnp.float32), 0.0, 1.0)
    L = (L_max - L_blk) * (V ** _DISPLAY_GAMMA) + L_blk + L_refl
    Y = jnp.clip(L, _PU21_Y_MIN, _PU21_Y_MAX)
    Yp = Y ** p4
    P = p7 * (((p1 + p2 * Yp) / (1.0 + p3 * Yp)) ** p5 - p6)
    P = P / _pu21_encode_np(100.0)
    return ((P - 0.5) / 0.5).astype(x.dtype)


if __name__ == "__main__":
    key = jax.random.PRNGKey(0)
    k1, k2 = jax.random.split(key)
    # Small NCHW RGB inputs in [0, 1] (3 channels to match the module's mean/std lists).
    x_small = jax.random.uniform(k1, (2, 3, 16, 16), dtype=jnp.float32)   # needs tiny pad
    x_big = jax.random.uniform(k2, (2, 3, 64, 64), dtype=jnp.float32)     # multiple of 8192 -> zero-copy path

    for x in (x_small, x_big):
        out = jax.block_until_ready(pu_display_forward(x))
        ref = _reference_forward(x)
        # Tolerance covers the trace-time polynomial fit error (<= 2.5e-4) plus f32 noise.
        np.testing.assert_allclose(np.asarray(out), np.asarray(ref), rtol=2e-3, atol=2e-3)
        assert out.shape == x.shape and out.dtype == x.dtype

    print("KERNEL_OK")
</pallas_src>

<mosaic_0001>
module attributes {stable_mosaic.version = 11 : i64} {
  func.func @kernel(%arg0: i32, %arg1: memref<8x1024xf32, #tpu.memory_space<vmem>>, %arg2: memref<8x1024xf32, #tpu.memory_space<vmem>>) attributes {dimension_semantics = [#tpu.dimension_semantics<parallel>], iteration_bounds = array<i64: 1>, scalar_prefetch = 0 : i64, scratch_operands = 0 : i64, tpu.core_type = #tpu.core_type<tc>, window_params = [{transform_indices = @transform_0, window_bounds = array<i64: 8, 1024>}, {transform_indices = @transform_1, window_bounds = array<i64: 8, 1024>}]} {
    %c0 = arith.constant 0 : index
    %c0_0 = arith.constant 0 : index
    %0 = vector.load %arg1[%c0, %c0_0] : memref<8x1024xf32, #tpu.memory_space<vmem>>, vector<8x1024xf32>
    %cst = arith.constant 0.000000e+00 : f32
    %cst_1 = arith.constant 1.000000e+00 : f32
    %1 = vector.broadcast %cst : f32 to vector<8x1024xf32>
    %2 = arith.maximumf %1, %0 : vector<8x1024xf32>
    %3 = vector.broadcast %cst_1 : f32 to vector<8x1024xf32>
    %4 = arith.minimumf %3, %2 : vector<8x1024xf32>
    %5 = math.sqrt %4 : vector<8x1024xf32>
    %cst_2 = arith.constant 2.000000e+00 : f32
    %6 = vector.broadcast %cst_2 : f32 to vector<8x1024xf32>
    %7 = arith.mulf %6, %5 : vector<8x1024xf32>
    %cst_3 = arith.constant 1.000000e+00 : f32
    %8 = vector.broadcast %cst_3 : f32 to vector<8x1024xf32>
    %9 = arith.subf %7, %8 : vector<8x1024xf32>
    %cst_4 = arith.constant -7.26483727 : f32
    %10 = vector.broadcast %cst_4 : f32 to vector<8x1024xf32>
    %11 = arith.mulf %10, %9 : vector<8x1024xf32>
    %cst_5 = arith.constant 3.8872683 : f32
    %12 = vector.broadcast %cst_5 : f32 to vector<8x1024xf32>
    %13 = arith.addf %11, %12 : vector<8x1024xf32>
    %14 = arith.mulf %13, %9 : vector<8x1024xf32>
    %cst_6 = arith.constant 30.7892189 : f32
    %15 = vector.broadcast %cst_6 : f32 to vector<8x1024xf32>
    %16 = arith.addf %14, %15 : vector<8x1024xf32>
    %17 = arith.mulf %16, %9 : vector<8x1024xf32>
    %cst_7 = arith.constant -18.3252487 : f32
    %18 = vector.broadcast %cst_7 : f32 to vector<8x1024xf32>
    %19 = arith.addf %17, %18 : vector<8x1024xf32>
    %20 = arith.mulf %19, %9 : vector<8x1024xf32>
    %cst_8 = arith.constant -51.1501389 : f32
    %21 = vector.broadcast %cst_8 : f32 to vector<8x1024xf32>
    %22 = arith.addf %20, %21 : vector<8x1024xf32>
    %23 = arith.mulf %22, %9 : vector<8x1024xf32>
    %cst_9 = arith.constant 34.2177505 : f32
    %24 = vector.broadcast %cst_9 : f32 to vector<8x1024xf32>
    %25 = arith.addf %23, %24 : vector<8x1024xf32>
    %26 = arith.mulf %25, %9 : vector<8x1024xf32>
    %cst_10 = arith.constant 40.4044724 : f32
    %27 = vector.broadcast %cst_10 : f32 to vector<8x1024xf32>
    %28 = arith.addf %26, %27 : vector<8x1024xf32>
    %29 = arith.mulf %28, %9 : vector<8x1024xf32>
    %cst_11 = arith.constant -30.9917812 : f32
    %30 = vector.broadcast %cst_11 : f32 to vector<8x1024xf32>
    %31 = arith.addf %29, %30 : vector<8x1024xf32>
    %32 = arith.mulf %31, %9 : vector<8x1024xf32>
    %cst_12 = arith.constant -13.9069662 : f32
    %33 = vector.broadcast %cst_12 : f32 to vector<8x1024xf32>
    %34 = arith.addf %32, %33 : vector<8x1024xf32>
    %35 = arith.mulf %34, %9 : vector<8x1024xf32>
    %cst_13 = arith.constant 12.7210636 : f32
    %36 = vector.broadcast %cst_13 : f32 to vector<8x1024xf32>
    %37 = arith.addf %35, %36 : vector<8x1024xf32>
    %38 = arith.mulf %37, %9 : vector<8x1024xf32>
    %cst_14 = arith.constant 1.47383749 : f32
    %39 = vector.broadcast %cst_14 : f32 to vector<8x1024xf32>
    %40 = arith.addf %38, %39 : vector<8x1024xf32>
    %41 = arith.mulf %40, %9 : vector<8x1024xf32>
    %cst_15 = arith.constant -1.46700752 : f32
    %42 = vector.broadcast %cst_15 : f32 to vector<8x1024xf32>
    %43 = arith.addf %41, %42 : vector<8x1024xf32>
    %44 = arith.mulf %43, %9 : vector<8x1024xf32>
    %cst_16 = arith.constant -0.864925801 : f32
    %45 = vector.broadcast %cst_16 : f32 to vector<8x1024xf32>
    %46 = arith.addf %44, %45 : vector<8x1024xf32>
    %47 = arith.mulf %46, %9 : vector<8x1024xf32>
    %cst_17 = arith.constant 5.774170e-01 : f32
    %48 = vector.broadcast %cst_17 : f32 to vector<8x1024xf32>
    %49 = arith.addf %47, %48 : vector<8x1024xf32>
    %50 = arith.mulf %49, %9 : vector<8x1024xf32>
    %cst_18 = arith.constant -0.0210889447 : f32
    %51 = vector.broadcast %cst_18 : f32 to vector<8x1024xf32>
    %52 = arith.addf %50, %51 : vector<8x1024xf32>
    %53 = arith.mulf %52, %9 : vector<8x1024xf32>
    %cst_19 = arith.constant -0.482198417 : f32
    %54 = vector.broadcast %cst_19 : f32 to vector<8x1024xf32>
    %55 = arith.addf %53, %54 : vector<8x1024xf32>
    %56 = arith.mulf %55, %9 : vector<8x1024xf32>
    %cst_20 = arith.constant 2.03620768 : f32
    %57 = vector.broadcast %cst_20 : f32 to vector<8x1024xf32>
    %58 = arith.addf %56, %57 : vector<8x1024xf32>
    %59 = arith.mulf %58, %9 : vector<8x1024xf32>
    %cst_21 = arith.constant 0.643792629 : f32
    %60 = vector.broadcast %cst_21 : f32 to vector<8x1024xf32>
    %61 = arith.addf %59, %60 : vector<8x1024xf32>
    %c0_22 = arith.constant 0 : index
    %c0_23 = arith.constant 0 : index
    %62 = vector.load %arg2[%c0_22, %c0_23] : memref<8x1024xf32, #tpu.memory_space<vmem>>, vector<8x1024xf32>
    tpu.vector_store %arg2[%c0_22, %c0_23], %61 {strides = array<i32>} : memref<8x1024xf32, #tpu.memory_space<vmem>>, vector<8x1024xf32>,
    return
  }
  func.func @transform_0(%arg0: i32) -> (i32, i32) {
    %c0_i32 = arith.constant 0 : i32
    %c0_i32_0 = arith.constant 0 : i32
    return %arg0, %c0_i32 : i32, i32
  }
  func.func @transform_1(%arg0: i32) -> (i32, i32) {
    %c0_i32 = arith.constant 0 : i32
    %c0_i32_0 = arith.constant 0 : i32
    return %arg0, %c0_i32 : i32, i32
  }
}

</mosaic_0001>

<bundles_post_ra>
// kernel: tpu_custom_call.1
= control target key start
LH: loop header
LB: loop body
LE: loop exit
PB: predicated region body
PF: predicated region fallthrough
CT: control target
= control target key end

     0   :  { %6 = vsyncpa [#allocation3], 0  ;;  %s826_s0 = inlined_call_operand.hbm [shape: f32[8,1024], index: 0, kind: input, shape index: {}]   ;;  %s827_s1 = inlined_call_operand.hbm [shape: f32[8,1024], index: 1, kind: output, shape index: {}]  }
   0x1   :  { %7 = vsyncpa [#allocation4], 0  ;;  %s13_s8 = sshll.u32 %s826_s0, 4  ;;  %s534_s9 = smov [#allocation2]   ;;  %s14_s8 = int_to_ptr.hbm [resolvable:$true] %s13_s8 }
   0x2   :  { %s15_s10 = sshll.u32 %s534_s9, 4  ;;  %s16_s10 = int_to_ptr.vmem [resolvable:$true] %s15_s10 }
   0x3   :  { %18 = dma.hbm_to_vmem [thread:$0]  %s14_s8, 1024, %s16_s10, [#allocation3]  }
   0x4   :  { %530 = dma.done.wait [#allocation3], 1024  }
   0x5   :  { %531 = vsyncadd [#allocation3], 4294966272  ;;  %v23_v0 = vld [vmem:[#allocation2] sm:$0xff]  ;;  %v24_v1 = vld [vmem:[#allocation2 + $0x8] sm:$0xff]  ;;  %s535_s0 = smov [#allocation5]   ;;  %s446_s14 = sshll.u32 %s827_s1, 4  ;;  %s447_s14 = int_to_ptr.hbm [resolvable:$true] %s446_s14 }
   0x6   :  { %v25_v2 = vld [vmem:[#allocation2 + $0x10] sm:$0xff]  ;;  %v31_v3 = vmax.f32 %v23_v0, 0.0  ;;  %v32_v4 = vmax.f32 %v24_v1, 0.0  ;;  %v26_v6 = vld [vmem:[#allocation2 + $0x18] sm:$0xff]  ;;  %v27_v7 = vld [vmem:[#allocation2 + $0x20] sm:$0xff]  ;;  %s444_s11 = sshll.u32 %s535_s0, 4  ;;  %s445_s11 = int_to_ptr.vmem [resolvable:$true] %s444_s11 }
   0x7   :  { %v33_v5 = vmax.f32 %v25_v2, 0.0  ;;  %v28_v8 = vld [vmem:[#allocation2 + $0x28] sm:$0xff]  ;;  %v34_v9 = vmax.f32 %v26_v6, 0.0  ;;  %v35_v10 = vmax.f32 %v27_v7, 0.0  ;;  %v29_v16 = vld [vmem:[#allocation2 + $0x30] sm:$0xff]  ;;  %v30_v17 = vld [vmem:[#allocation2 + $0x38] sm:$0xff] }
   0x8   :  { %v36_v11 = vmax.f32 %v28_v8, 0.0  ;;  %v549_v12 = vmin.f32 %v31_v3, 1.0  ;;  %v551_v13 = vmin.f32 %v32_v4, 1.0  ;;  %v37_v20 = vmax.f32 %v29_v16, 0.0 }
   0x9   :  { %v553_v14 = vmin.f32 %v33_v5, 1.0  ;;  %v555_v15 = vmin.f32 %v34_v9, 1.0  ;;  %v558_v18 = vmin.f32 %v35_v10, 1.0  ;;  %v38_v21 = vmax.f32 %v30_v17, 0.0 }
   0xa   :  { %466 = vrsqrt.f32 %v549_v12  ;;  %v561_v19 = vmin.f32 %v36_v11, 1.0  ;;  %v567_v23 = vmin.f32 %v37_v20, 1.0  ;;  %vm54_vm0 = vcmp.eq.f32.partialorder %v549_v12, inf }
   0xb   :  { %468 = vrsqrt.f32 %v551_v13  ;;  %v569_v24 = vmin.f32 %v38_v21, 1.0  ;;  %v57_v28 = vand.u32 2147483648, %v549_v12  ;;  %vm56_vm1 = vcmp.eq.f32.partialorder %v549_v12, 0.0 }
   0xc   :  { %470 = vrsqrt.f32 %v553_v14  ;;  %vm66_vm2 = vcmp.eq.f32.partialorder %v551_v13, inf  ;;  %v69_v32 = vand.u32 2147483648, %v551_v13  ;;  %vm68_vm3 = vcmp.eq.f32.partialorder %v551_v13, 0.0 }
   0xd   :  { %472 = vrsqrt.f32 %v555_v15  ;;  %vm78_vm4 = vcmp.eq.f32.partialorder %v553_v14, inf  ;;  %v81_v36 = vand.u32 2147483648, %v553_v14  ;;  %v93_v38 = vand.u32 2147483648, %v555_v15 }
   0xe   :  { %474 = vrsqrt.f32 %v558_v18  ;;  %vm80_vm5 = vcmp.eq.f32.partialorder %v553_v14, 0.0  ;;  %vm90_vm6 = vcmp.eq.f32.partialorder %v555_v15, inf  ;;  %v105_v43 = vand.u32 2147483648, %v558_v18 }
   0xf   :  { %476 = vrsqrt.f32 %v561_v19  ;;  %vm92_vm7 = vcmp.eq.f32.partialorder %v555_v15, 0.0  ;;  %vm102_vm8 = vcmp.eq.f32.partialorder %v558_v18, inf  ;;  %v117_v47 = vand.u32 2147483648, %v561_v19 }
  0x10   :  { %v467_v22 = vpop.eup %466  ;;  %478 = vrsqrt.f32 %v567_v23  ;;  %vm104_vm9 = vcmp.eq.f32.partialorder %v558_v18, 0.0  ;;  %vm114_vm10 = vcmp.eq.f32.partialorder %v561_v19, inf  ;;  %v129_v51 = vand.u32 2147483648, %v567_v23 }
  0x11   :  { %v469_v25 = vpop.eup %468  ;;  %v48_v26 = vmul.f32 %v467_v22, %v549_v12  ;;  %480 = vrsqrt.f32 %v569_v24  ;;  %vm116_vm11 = vcmp.eq.f32.partialorder %v561_v19, 0.0  ;;  %v141_v56 = vand.u32 2147483648, %v569_v24 }
  0x12   :  { %v471_v27 = vpop.eup %470  ;;  %v60_v29 = vmul.f32 %v469_v25, %v551_v13  ;;  %vm126_vm12 = vcmp.eq.f32.partialorder %v567_v23, inf  ;;  %vm128_vm13 = vcmp.eq.f32.partialorder %v567_v23, 0.0  ;;  %vm138_vm14 = vcmp.eq.f32.partialorder %v569_v24, inf }
  0x13   :  { %v473_v30 = vpop.eup %472  ;;  %v49_v31 = vmul.f32 %v467_v22, %v48_v26  ;;  %v72_v33 = vmul.f32 %v471_v27, %v553_v14  ;;  %vm140_vm15 = vcmp.eq.f32.partialorder %v569_v24, 0.0 }
  0x14   :  { %v475_v34 = vpop.eup %474  ;;  %v61_v35 = vmul.f32 %v469_v25, %v60_v29  ;;  %v84_v37 = vmul.f32 %v473_v30, %v555_v15 }
  0x15   :  { %v477_v39 = vpop.eup %476  ;;  %v50_v40 = vmul.f32 0.5, %v49_v31  ;;  %v73_v41 = vmul.f32 %v471_v27, %v72_v33  ;;  %v96_v42 = vmul.f32 %v475_v34, %v558_v18 }
  0x16   :  { %v62_v44 = vmul.f32 0.5, %v61_v35  ;;  %v85_v45 = vmul.f32 %v473_v30, %v84_v37  ;;  %v108_v46 = vmul.f32 %v477_v39, %v561_v19  ;;  %v597_v52 = vpop.eup %478 }
  0x17   :  { %v51_v48 = vsub.f32 1.5, %v50_v40  ;;  %v74_v49 = vmul.f32 0.5, %v73_v41  ;;  %v97_v50 = vmul.f32 %v475_v34, %v96_v42  ;;  %v601_v57 = vpop.eup %480  ;;  %v120_v61 = vmul.f32 %v597_v52, %v567_v23 }
  0x18   :  { %v63_v53 = vsub.f32 1.5, %v62_v44  ;;  %v86_v54 = vmul.f32 0.5, %v85_v45  ;;  %v109_v55 = vmul.f32 %v477_v39, %v108_v46  ;;  %v132_v1 = vmul.f32 %v601_v57, %v569_v24 }
  0x19   :  { %v52_v58 = vmul.f32 %v467_v22, %v51_v48  ;;  %v75_v59 = vsub.f32 1.5, %v74_v49  ;;  %v98_v60 = vmul.f32 0.5, %v97_v50  ;;  %v121_v5 = vmul.f32 %v597_v52, %v120_v61 }
  0x1a   :  { %v64_v62 = vmul.f32 %v469_v25, %v63_v53  ;;  %v87_v63 = vsub.f32 1.5, %v86_v54  ;;  %v110_v0 = vmul.f32 0.5, %v109_v55  ;;  %v133_v9 = vmul.f32 %v601_v57, %v132_v1 }
  0x1b   :  { %v53_v2 = vmul.f32 %v52_v58, %v549_v12  ;;  %v76_v3 = vmul.f32 %v471_v27, %v75_v59  ;;  %v99_v4 = vsub.f32 1.5, %v98_v60  ;;  %v122_v17 = vmul.f32 0.5, %v121_v5 }
  0x1c   :  { %v65_v6 = vmul.f32 %v64_v62, %v551_v13  ;;  %v88_v7 = vmul.f32 %v473_v30, %v87_v63  ;;  %v111_v8 = vsub.f32 1.5, %v110_v0  ;;  %v134_v49 = vmul.f32 0.5, %v133_v9 }
  0x1d   :  { %v55_v10 = vsel %vm54_vm0, %v549_v12, %v53_v2  ;;  %v77_v11 = vmul.f32 %v76_v3, %v553_v14  ;;  %v100_v16 = vmul.f32 %v475_v34, %v99_v4  ;;  %v123_v46 = vsub.f32 1.5, %v122_v17 }
  0x1e   :  { %v58_v20 = vsel %vm56_vm1, %v57_v28, %v55_v10  ;;  %v67_v21 = vsel %vm66_vm2, %v551_v13, %v65_v6  ;;  %v89_v22 = vmul.f32 %v88_v7, %v555_v15  ;;  %v112_v25 = vmul.f32 %v477_v39, %v111_v8 }
  0x1f   :  { %v143_v26 = vmul.f32 2.0, %v58_v20  ;;  %v70_v27 = vsel %vm68_vm3, %v69_v32, %v67_v21  ;;  %v79_v29 = vsel %vm78_vm4, %v553_v14, %v77_v11  ;;  %v101_v30 = vmul.f32 %v100_v16, %v558_v18 }
  0x20   :  { %v144_v12 = vmul.f32 2.0, %v70_v27  ;;  %v82_v28 = vsel %vm80_vm5, %v81_v36, %v79_v29  ;;  %v91_v31 = vsel %vm90_vm6, %v555_v15, %v89_v22  ;;  %v113_v33 = vmul.f32 %v112_v25, %v561_v19 }
  0x21   :  { %v637_v13 = vadd.f32 -1.0, %v143_v26  ;;  %v145_v32 = vmul.f32 2.0, %v82_v28  ;;  %v94_v34 = vsel %vm92_vm7, %v93_v38, %v91_v31  ;;  %v103_v14 = vsel %vm102_vm8, %v558_v18, %v101_v30 }
  0x22   :  { %v646_v35 = vadd.f32 -1.0, %v144_v12  ;;  %v146_v36 = vmul.f32 2.0, %v94_v34  ;;  %v106_v37 = vsel %vm104_vm9, %v105_v43, %v103_v14  ;;  %v115_v39 = vsel %vm114_vm10, %v561_v19, %v113_v33 }
  0x23   :  { %v159_v40 = vmul.f32 -7.2648373, %v637_v13  ;;  %v654_v41 = vadd.f32 -1.0, %v145_v32  ;;  %v147_v15 = vmul.f32 2.0, %v106_v37  ;;  %v118_v38 = vsel %vm116_vm11, %v117_v47, %v115_v39 }
  0x24   :  { %v160_v42 = vmul.f32 -7.2648373, %v646_v35  ;;  %v659_v44 = vadd.f32 -1.0, %v146_v36  ;;  %v148_v45 = vmul.f32 2.0, %v118_v38  ;;  %v124_v19 = vmul.f32 %v597_v52, %v123_v46 }
  0x25   :  { %v167_v18 = vadd.f32 3.8872683, %v159_v40  ;;  %v161_v43 = vmul.f32 -7.2648373, %v654_v41  ;;  %v663_v48 = vadd.f32 -1.0, %v147_v15  ;;  %v135_v59 = vsub.f32 1.5, %v134_v49 }
  0x26   :  { %v168_v50 = vadd.f32 3.8872683, %v160_v42  ;;  %v162_v53 = vmul.f32 -7.2648373, %v659_v44  ;;  %v666_v54 = vadd.f32 -1.0, %v148_v45  ;;  %v125_v63 = vmul.f32 %v124_v19, %v567_v23 }
  0x27   :  { %v175_v47 = vmul.f32 %v637_v13, %v167_v18  ;;  %v169_v55 = vadd.f32 3.8872683, %v161_v43  ;;  %v163_v58 = vmul.f32 -7.2648373, %v663_v48  ;;  %v136_v52 = vmul.f32 %v601_v57, %v135_v59 }
  0x28   :  { %v176_v60 = vmul.f32 %v646_v35, %v168_v50  ;;  %v170_v61 = vadd.f32 3.8872683, %v162_v53  ;;  %v164_v62 = vmul.f32 -7.2648373, %v666_v54  ;;  %v127_v6 = vsel %vm126_vm12, %v567_v23, %v125_v63 }
  0x29   :  { %v183_v0 = vadd.f32 30.789219, %v175_v47  ;;  %v177_v1 = vmul.f32 %v654_v41, %v169_v55  ;;  %v171_v2 = vadd.f32 3.8872683, %v163_v58  ;;  %v130_v10 = vsel %vm128_vm13, %v129_v51, %v127_v6 }
  0x2a   :  { %v184_v3 = vadd.f32 30.789219, %v176_v60  ;;  %v178_v4 = vmul.f32 %v659_v44, %v170_v61  ;;  %v172_v5 = vadd.f32 3.8872683, %v164_v62  ;;  %v149_v17 = vmul.f32 2.0, %v130_v10 }
  0x2b   :  { %v191_v7 = vmul.f32 %v637_v13, %v183_v0  ;;  %v185_v8 = vadd.f32 30.789219, %v177_v1  ;;  %v179_v9 = vmul.f32 %v663_v48, %v171_v2  ;;  %v137_v25 = vmul.f32 %v136_v52, %v569_v24 }
  0x2c   :  { %v192_v57 = vmul.f32 %v646_v35, %v184_v3  ;;  %v186_v11 = vadd.f32 30.789219, %v178_v4  ;;  %v180_v16 = vmul.f32 %v666_v54, %v172_v5  ;;  %v692_v30 = vadd.f32 -1.0, %v149_v17 }
  0x2d   :  { %v199_v20 = vadd.f32 -18.325249, %v191_v7  ;;  %v193_v21 = vmul.f32 %v654_v41, %v185_v8  ;;  %v187_v22 = vadd.f32 30.789219, %v179_v9  ;;  %v139_v28 = vsel %vm138_vm14, %v569_v24, %v137_v25 }
  0x2e   :  { %v200_v26 = vadd.f32 -18.325249, %v192_v57  ;;  %v194_v27 = vmul.f32 %v659_v44, %v186_v11  ;;  %v188_v29 = vadd.f32 30.789219, %v180_v16  ;;  %v165_v34 = vmul.f32 -7.2648373, %v692_v30 }
  0x2f   :  { %v207_v23 = vmul.f32 %v637_v13, %v199_v20  ;;  %v201_v51 = vadd.f32 -18.325249, %v193_v21  ;;  %v195_v12 = vmul.f32 %v663_v48, %v187_v22  ;;  %v142_v39 = vsel %vm140_vm15, %v141_v56, %v139_v28 }
  0x30   :  { %v208_v31 = vmul.f32 %v646_v35, %v200_v26  ;;  %v202_v33 = vadd.f32 -18.325249, %v194_v27  ;;  %v196_v32 = vmul.f32 %v666_v54, %v188_v29  ;;  %v173_v42 = vadd.f32 3.8872683, %v165_v34 }
  0x31   :  { %v215_v14 = vadd.f32 -51.15014, %v207_v23  ;;  %v209_v36 = vmul.f32 %v654_v41, %v201_v51  ;;  %v203_v37 = vadd.f32 -18.325249, %v195_v12  ;;  %v150_v43 = vmul.f32 2.0, %v142_v39 }
  0x32   :  { %v216_v40 = vadd.f32 -51.15014, %v208_v31  ;;  %v210_v15 = vmul.f32 %v659_v44, %v202_v33  ;;  %v204_v38 = vadd.f32 -18.325249, %v196_v32  ;;  %v181_v19 = vmul.f32 %v692_v30, %v173_v42 }
  0x33   :  { %v223_v45 = vmul.f32 %v637_v13, %v215_v14  ;;  %v217_v46 = vadd.f32 -51.15014, %v209_v36  ;;  %v211_v18 = vmul.f32 %v663_v48, %v203_v37  ;;  %v714_v55 = vadd.f32 -1.0, %v150_v43 }
  0x34   :  { %v224_v49 = vmul.f32 %v646_v35, %v216_v40  ;;  %v218_v50 = vadd.f32 -51.15014, %v210_v15  ;;  %v212_v53 = vmul.f32 %v666_v54, %v204_v38  ;;  %v189_v61 = vadd.f32 30.789219, %v181_v19 }
  0x35   :  { %v231_v24 = vadd.f32 34.21775, %v223_v45  ;;  %v225_v56 = vmul.f32 %v654_v41, %v217_v46  ;;  %v219_v47 = vadd.f32 -51.15014, %v211_v18  ;;  %v166_v1 = vmul.f32 -7.2648373, %v714_v55 }
  0x36   :  { %v232_v58 = vadd.f32 34.21775, %v224_v49  ;;  %v226_v59 = vmul.f32 %v659_v44, %v218_v50  ;;  %v220_v60 = vadd.f32 -51.15014, %v212_v53  ;;  %v197_v4 = vmul.f32 %v692_v30, %v189_v61 }
  0x37   :  { %v239_v62 = vmul.f32 %v637_v13, %v231_v24  ;;  %v233_v63 = vadd.f32 34.21775, %v225_v56  ;;  %v227_v0 = vmul.f32 %v663_v48, %v219_v47  ;;  %v174_v8 = vadd.f32 3.8872683, %v166_v1 }
  0x38   :  { %v240_v2 = vmul.f32 %v646_v35, %v232_v58  ;;  %v234_v52 = vadd.f32 34.21775, %v226_v59  ;;  %v228_v3 = vmul.f32 %v666_v54, %v220_v60  ;;  %v205_v11 = vadd.f32 -18.325249, %v197_v4 }
  0x39   :  { %v247_v5 = vadd.f32 40.404472, %v239_v62  ;;  %v241_v6 = vmul.f32 %v654_v41, %v233_v63  ;;  %v235_v7 = vadd.f32 34.21775, %v227_v0  ;;  %v182_v21 = vmul.f32 %v714_v55, %v174_v8 }
  0x3a   :  { %v248_v9 = vadd.f32 40.404472, %v240_v2  ;;  %v242_v10 = vmul.f32 %v659_v44, %v234_v52  ;;  %v236_v57 = vadd.f32 34.21775, %v228_v3  ;;  %v213_v27 = vmul.f32 %v692_v30, %v205_v11 }
  0x3b   :  { %v255_v16 = vmul.f32 %v637_v13, %v247_v5  ;;  %v249_v17 = vadd.f32 40.404472, %v241_v6  ;;  %v243_v20 = vmul.f32 %v663_v48, %v235_v7  ;;  %v190_v12 = vadd.f32 30.789219, %v182_v21 }
  0x3c   :  { %v256_v22 = vmul.f32 %v646_v35, %v248_v9  ;;  %v250_v25 = vadd.f32 40.404472, %v242_v10  ;;  %v244_v26 = vmul.f32 %v666_v54, %v236_v57  ;;  %v221_v32 = vadd.f32 -51.15014, %v213_v27 }
  0x3d   :  { %v263_v29 = vadd.f32 -30.991781, %v255_v16  ;;  %v257_v23 = vmul.f32 %v654_v41, %v249_v17  ;;  %v251_v51 = vadd.f32 40.404472, %v243_v20  ;;  %v198_v37 = vmul.f32 %v714_v55, %v190_v12 }
  0x3e   :  { %v264_v28 = vadd.f32 -30.991781, %v256_v22  ;;  %v258_v31 = vmul.f32 %v659_v44, %v250_v25  ;;  %v252_v33 = vadd.f32 40.404472, %v244_v26  ;;  %v229_v38 = vmul.f32 %v692_v30, %v221_v32 }
  0x3f   :  { %v271_v34 = vmul.f32 %v637_v13, %v263_v29  ;;  %v265_v14 = vadd.f32 -30.991781, %v257_v23  ;;  %v259_v36 = vmul.f32 %v663_v48, %v251_v51  ;;  %v206_v18 = vadd.f32 -18.325249, %v198_v37 }
  0x40   :  { %v272_v39 = vmul.f32 %v646_v35, %v264_v28  ;;  %v266_v40 = vadd.f32 -30.991781, %v258_v31  ;;  %v260_v15 = vmul.f32 %v666_v54, %v252_v33  ;;  %v237_v53 = vadd.f32 34.21775, %v229_v38 }
  0x41   :  { %v279_v42 = vadd.f32 -13.906966, %v271_v34  ;;  %v273_v45 = vmul.f32 %v654_v41, %v265_v14  ;;  %v267_v46 = vadd.f32 -30.991781, %v259_v36  ;;  %v214_v47 = vmul.f32 %v714_v55, %v206_v18 }
  0x42   :  { %v280_v43 = vadd.f32 -13.906966, %v272_v39  ;;  %v274_v49 = vmul.f32 %v659_v44, %v266_v40  ;;  %v268_v50 = vadd.f32 -30.991781, %v260_v15  ;;  %v245_v61 = vmul.f32 %v692_v30, %v237_v53 }
  0x43   :  { %v287_v19 = vmul.f32 %v637_v13, %v279_v42  ;;  %v281_v24 = vadd.f32 -13.906966, %v273_v45  ;;  %v275_v56 = vmul.f32 %v663_v48, %v267_v46  ;;  %v222_v1 = vadd.f32 -51.15014, %v214_v47 }
  0x44   :  { %v288_v58 = vmul.f32 %v646_v35, %v280_v43  ;;  %v282_v59 = vadd.f32 -13.906966, %v274_v49  ;;  %v276_v60 = vmul.f32 %v666_v54, %v268_v50  ;;  %v253_v4 = vadd.f32 40.404472, %v245_v61 }
  0x45   :  { %v295_v62 = vadd.f32 12.721064, %v287_v19  ;;  %v289_v63 = vmul.f32 %v654_v41, %v281_v24  ;;  %v283_v0 = vadd.f32 -13.906966, %v275_v56  ;;  %v230_v8 = vmul.f32 %v714_v55, %v222_v1 }
  0x46   :  { %v296_v2 = vadd.f32 12.721064, %v288_v58  ;;  %v290_v52 = vmul.f32 %v659_v44, %v282_v59  ;;  %v284_v3 = vadd.f32 -13.906966, %v276_v60  ;;  %v261_v11 = vmul.f32 %v692_v30, %v253_v4 }
  0x47   :  { %v303_v5 = vmul.f32 %v637_v13, %v295_v62  ;;  %v297_v6 = vadd.f32 12.721064, %v289_v63  ;;  %v291_v7 = vmul.f32 %v663_v48, %v283_v0  ;;  %v238_v21 = vadd.f32 34.21775, %v230_v8 }
  0x48   :  { %v304_v9 = vmul.f32 %v646_v35, %v296_v2  ;;  %v298_v10 = vadd.f32 12.721064, %v290_v52  ;;  %v292_v57 = vmul.f32 %v666_v54, %v284_v3  ;;  %v269_v27 = vadd.f32 -30.991781, %v261_v11 }
  0x49   :  { %v311_v16 = vadd.f32 1.4738375, %v303_v5  ;;  %v305_v17 = vmul.f32 %v654_v41, %v297_v6  ;;  %v299_v20 = vadd.f32 12.721064, %v291_v7  ;;  %v246_v12 = vmul.f32 %v714_v55, %v238_v21 }
  0x4a   :  { %v312_v22 = vadd.f32 1.4738375, %v304_v9  ;;  %v306_v25 = vmul.f32 %v659_v44, %v298_v10  ;;  %v300_v26 = vadd.f32 12.721064, %v292_v57  ;;  %v277_v32 = vmul.f32 %v692_v30, %v269_v27 }
  0x4b   :  { %v319_v29 = vmul.f32 %v637_v13, %v311_v16  ;;  %v313_v23 = vadd.f32 1.4738375, %v305_v17  ;;  %v307_v51 = vmul.f32 %v663_v48, %v299_v20  ;;  %v254_v37 = vadd.f32 40.404472, %v246_v12 }
  0x4c   :  { %v320_v28 = vmul.f32 %v646_v35, %v312_v22  ;;  %v314_v31 = vadd.f32 1.4738375, %v306_v25  ;;  %v308_v33 = vmul.f32 %v666_v54, %v300_v26  ;;  %v285_v38 = vadd.f32 -13.906966, %v277_v32 }
  0x4d   :  { %v327_v34 = vadd.f32 -1.4670075, %v319_v29  ;;  %v321_v14 = vmul.f32 %v654_v41, %v313_v23  ;;  %v315_v36 = vadd.f32 1.4738375, %v307_v51  ;;  %v262_v18 = vmul.f32 %v714_v55, %v254_v37 }
  0x4e   :  { %v328_v39 = vadd.f32 -1.4670075, %v320_v28  ;;  %v322_v40 = vmul.f32 %v659_v44, %v314_v31  ;;  %v316_v15 = vadd.f32 1.4738375, %v308_v33  ;;  %v293_v53 = vmul.f32 %v692_v30, %v285_v38 }
  0x4f   :  { %v335_v42 = vmul.f32 %v637_v13, %v327_v34  ;;  %v329_v45 = vadd.f32 -1.4670075, %v321_v14  ;;  %v323_v46 = vmul.f32 %v663_v48, %v315_v36  ;;  %v270_v47 = vadd.f32 -30.991781, %v262_v18 }
  0x50   :  { %v336_v43 = vmul.f32 %v646_v35, %v328_v39  ;;  %v330_v49 = vadd.f32 -1.4670075, %v322_v40  ;;  %v324_v50 = vmul.f32 %v666_v54, %v316_v15  ;;  %v301_v61 = vadd.f32 12.721064, %v293_v53 }
  0x51   :  { %v343_v19 = vadd.f32 -0.8649258, %v335_v42  ;;  %v337_v24 = vmul.f32 %v654_v41, %v329_v45  ;;  %v331_v56 = vadd.f32 -1.4670075, %v323_v46  ;;  %v278_v1 = vmul.f32 %v714_v55, %v270_v47 }
  0x52   :  { %v344_v58 = vadd.f32 -0.8649258, %v336_v43  ;;  %v338_v59 = vmul.f32 %v659_v44, %v330_v49  ;;  %v332_v60 = vadd.f32 -1.4670075, %v324_v50  ;;  %v309_v4 = vmul.f32 %v692_v30, %v301_v61 }
  0x53   :  { %v351_v62 = vmul.f32 %v637_v13, %v343_v19  ;;  %v345_v63 = vadd.f32 -0.8649258, %v337_v24  ;;  %v339_v0 = vmul.f32 %v663_v48, %v331_v56  ;;  %v286_v8 = vadd.f32 -13.906966, %v278_v1 }
  0x54   :  { %v352_v2 = vmul.f32 %v646_v35, %v344_v58  ;;  %v346_v52 = vadd.f32 -0.8649258, %v338_v59  ;;  %v340_v3 = vmul.f32 %v666_v54, %v332_v60  ;;  %v317_v11 = vadd.f32 1.4738375, %v309_v4 }
  0x55   :  { %v359_v5 = vadd.f32 0.577417, %v351_v62  ;;  %v353_v6 = vmul.f32 %v654_v41, %v345_v63  ;;  %v347_v7 = vadd.f32 -0.8649258, %v339_v0  ;;  %v294_v21 = vmul.f32 %v714_v55, %v286_v8 }
  0x56   :  { %v360_v9 = vadd.f32 0.577417, %v352_v2  ;;  %v354_v10 = vmul.f32 %v659_v44, %v346_v52  ;;  %v348_v57 = vadd.f32 -0.8649258, %v340_v3  ;;  %v325_v27 = vmul.f32 %v692_v30, %v317_v11 }
  0x57   :  { %v367_v16 = vmul.f32 %v637_v13, %v359_v5  ;;  %v361_v17 = vadd.f32 0.577417, %v353_v6  ;;  %v355_v20 = vmul.f32 %v663_v48, %v347_v7  ;;  %v302_v12 = vadd.f32 12.721064, %v294_v21 }
  0x58   :  { %v368_v22 = vmul.f32 %v646_v35, %v360_v9  ;;  %v362_v25 = vadd.f32 0.577417, %v354_v10  ;;  %v356_v26 = vmul.f32 %v666_v54, %v348_v57  ;;  %v333_v32 = vadd.f32 -1.4670075, %v325_v27 }
  0x59   :  { %v375_v29 = vadd.f32 -0.021088945, %v367_v16  ;;  %v369_v23 = vmul.f32 %v654_v41, %v361_v17  ;;  %v363_v51 = vadd.f32 0.577417, %v355_v20  ;;  %v310_v37 = vmul.f32 %v714_v55, %v302_v12 }
  0x5a   :  { %v376_v28 = vadd.f32 -0.021088945, %v368_v22  ;;  %v370_v31 = vmul.f32 %v659_v44, %v362_v25  ;;  %v364_v33 = vadd.f32 0.577417, %v356_v26  ;;  %v341_v38 = vmul.f32 %v692_v30, %v333_v32 }
  0x5b   :  { %v383_v34 = vmul.f32 %v637_v13, %v375_v29  ;;  %v377_v14 = vadd.f32 -0.021088945, %v369_v23  ;;  %v371_v36 = vmul.f32 %v663_v48, %v363_v51  ;;  %v318_v18 = vadd.f32 1.4738375, %v310_v37 }
  0x5c   :  { %v384_v39 = vmul.f32 %v646_v35, %v376_v28  ;;  %v378_v40 = vadd.f32 -0.021088945, %v370_v31  ;;  %v372_v15 = vmul.f32 %v666_v54, %v364_v33  ;;  %v349_v53 = vadd.f32 -0.8649258, %v341_v38 }
  0x5d   :  { %v391_v42 = vadd.f32 -0.48219842, %v383_v34  ;;  %v385_v45 = vmul.f32 %v654_v41, %v377_v14  ;;  %v379_v46 = vadd.f32 -0.021088945, %v371_v36  ;;  %v326_v47 = vmul.f32 %v714_v55, %v318_v18 }
  0x5e   :  { %v392_v43 = vadd.f32 -0.48219842, %v384_v39  ;;  %v386_v49 = vmul.f32 %v659_v44, %v378_v40  ;;  %v380_v50 = vadd.f32 -0.021088945, %v372_v15  ;;  %v357_v61 = vmul.f32 %v692_v30, %v349_v53 }
  0x5f   :  { %v399_v19 = vmul.f32 %v637_v13, %v391_v42  ;;  %v393_v24 = vadd.f32 -0.48219842, %v385_v45  ;;  %v387_v56 = vmul.f32 %v663_v48, %v379_v46  ;;  %v334_v1 = vadd.f32 -1.4670075, %v326_v47 }
  0x60   :  { %v400_v58 = vmul.f32 %v646_v35, %v392_v43  ;;  %v394_v59 = vadd.f32 -0.48219842, %v386_v49  ;;  %v388_v60 = vmul.f32 %v666_v54, %v380_v50  ;;  %v365_v4 = vadd.f32 0.577417, %v357_v61 }
  0x61   :  { %v407_v62 = vadd.f32 2.0362077, %v399_v19  ;;  %v401_v63 = vmul.f32 %v654_v41, %v393_v24  ;;  %v395_v0 = vadd.f32 -0.48219842, %v387_v56  ;;  %v342_v8 = vmul.f32 %v714_v55, %v334_v1 }
  0x62   :  { %v408_v2 = vadd.f32 2.0362077, %v400_v58  ;;  %v402_v52 = vmul.f32 %v659_v44, %v394_v59  ;;  %v396_v3 = vadd.f32 -0.48219842, %v388_v60  ;;  %v373_v11 = vmul.f32 %v692_v30, %v365_v4 }
  0x63   :  { %v415_v5 = vmul.f32 %v637_v13, %v407_v62  ;;  %v409_v6 = vadd.f32 2.0362077, %v401_v63  ;;  %v403_v7 = vmul.f32 %v663_v48, %v395_v0  ;;  %v350_v21 = vadd.f32 -0.8649258, %v342_v8 }
  0x64   :  { %v416_v9 = vmul.f32 %v646_v35, %v408_v2  ;;  %v410_v10 = vadd.f32 2.0362077, %v402_v52  ;;  %v404_v57 = vmul.f32 %v666_v54, %v396_v3  ;;  %v381_v26 = vadd.f32 -0.021088945, %v373_v11 }
  0x65   :  { %v423_v16 = vadd.f32 0.6437926, %v415_v5  ;;  %v417_v17 = vmul.f32 %v654_v41, %v409_v6  ;;  %v411_v20 = vadd.f32 2.0362077, %v403_v7  ;;  %v358_v35 = vmul.f32 %v714_v55, %v350_v21 }
  0x66   :  { %v424_v22 = vadd.f32 0.6437926, %v416_v9  ;;  %v418_v13 = vmul.f32 %v659_v44, %v410_v10  ;;  %v412_v25 = vadd.f32 2.0362077, %v404_v57  ;;  %v389_v12 = vmul.f32 %v692_v30, %v381_v26 }
  0x67   :  { %431 = vst [vmem:[#allocation5] sm:$0xff] %v423_v16  ;;  %v425_v27 = vadd.f32 0.6437926, %v417_v17  ;;  %v419_v29 = vmul.f32 %v663_v48, %v411_v20  ;;  %v366_v28 = vadd.f32 0.577417, %v358_v35 }
  0x68   :  { %432 = vst [vmem:[#allocation5 + $0x8] sm:$0xff] %v424_v22  ;;  %v426_v23 = vadd.f32 0.6437926, %v418_v13  ;;  %v420_v51 = vmul.f32 %v666_v54, %v412_v25  ;;  %v397_v44 = vadd.f32 -0.48219842, %v389_v12 }
  0x69   :  { %433 = vst [vmem:[#allocation5 + $0x10] sm:$0xff] %v425_v27  ;;  %v427_v41 = vadd.f32 0.6437926, %v419_v29  ;;  %v374_v33 = vmul.f32 %v714_v55, %v366_v28 }
  0x6a   :  { %434 = vst [vmem:[#allocation5 + $0x18] sm:$0xff] %v426_v23  ;;  %v428_v31 = vadd.f32 0.6437926, %v420_v51  ;;  %v405_v48 = vmul.f32 %v692_v30, %v397_v44 }
  0x6b   :  { %435 = vst [vmem:[#allocation5 + $0x20] sm:$0xff] %v427_v41  ;;  %v382_v32 = vadd.f32 -0.021088945, %v374_v33 }
  0x6c   :  { %436 = vst [vmem:[#allocation5 + $0x28] sm:$0xff] %v428_v31  ;;  %v413_v34 = vadd.f32 2.0362077, %v405_v48 }
  0x6d   :  { %v390_v14 = vmul.f32 %v714_v55, %v382_v32 }
  0x6e   :  { %v421_v54 = vmul.f32 %v692_v30, %v413_v34 }
  0x6f   :  { %v398_v36 = vadd.f32 -0.48219842, %v390_v14 }
  0x70   :  { %v429_v37 = vadd.f32 0.6437926, %v421_v54 }
  0x71   :  { %v406_v39 = vmul.f32 %v714_v55, %v398_v36 }
  0x72   :  { %437 = vst [vmem:[#allocation5 + $0x30] sm:$0xff] %v429_v37 }
  0x73   :  { %v414_v40 = vadd.f32 2.0362077, %v406_v39 }
  0x75   :  { %v422_v15 = vmul.f32 %v714_v55, %v414_v40 }
  0x77   :  { %v430_v38 = vadd.f32 0.6437926, %v422_v15 }
  0x79   :  { %438 = vst [vmem:[#allocation5 + $0x38] sm:$0xff] %v430_v38 }
  0x7a   :  { %449 = dma.vmem_to_hbm [thread:$0]  %s445_s11, 1024, %s447_s14, [#allocation4]  }
  0x7b   :  { %532 = dma.done.wait [#allocation4], 1024  }
  0x7c   :  { %533 = vsyncadd [#allocation4], 4294966272 }
  0x7d   :  { %454 = vsyncpa [#allocation3], 1 }
  0x7e   :  { %455 = vsyncpa [#allocation4], 1 }

</bundles_post_ra>
